<compile_context>
chip_gen: v7x
topology: tpu7x:2x2x1
jax: 0.10.0
libtpu: 0.0.40
codegen_flags: <defaults>
</compile_context>

<pallas_src>
import functools

import jax
import jax.numpy as jnp
from jax import lax
from jax.experimental import pallas as pl
from jax.experimental.pallas import tpu as pltpu

LANE = 128               # vreg lane width
SUBLANE = 8              # f32 vreg sublane height
TARGET_TILE_ROWS = 4096  # 4096 x 128 x 4B = 2 MiB per f32 input tile


def _cdiv(a, b):
    return -(-a // b)


def _round_up(a, b):
    return _cdiv(a, b) * b


def _num_tensorcores():
    """2 TensorCores per chip only on v7x; v5e/v6e have 1.  Default to 1."""
    try:
        kind = jax.devices()[0].device_kind.lower()
    except Exception:
        return 1
    return 2 if "v7" in kind else 1


def _sublane_multiple(dtype):
    """Minimum sublane tile for a dtype: 8 (>=32-bit), 16 (16-bit), 32 (8-bit)."""
    itemsize = jnp.dtype(dtype).itemsize
    if itemsize >= 4:
        return SUBLANE
    return SUBLANE * (4 // itemsize)


def _make_kernel(eps, rows, tile_rows, n_inner, need_mask):
    eps = float(eps)  # plain Python float -> inlined literal, not a captured array

    def kernel(x_ref, y_ref, o_ref):
        i = pl.program_id(1)

        @pl.when(i == 0)
        def _():
            o_ref[...] = jnp.zeros_like(o_ref)

        # Pure VPU/EUP work per step: diff, fma, sqrt, vreg-add tree.
        diff = x_ref[...].astype(jnp.float32) - y_ref[...].astype(jnp.float32)
        val = jnp.sqrt(diff * diff + eps)

        if need_mask:
            # Only emitted (statically) when the grid over-covers the rows.
            # Out-of-bounds rows of the last (partial) block are zeroed; the
            # where() also discards any garbage/NaN read from the padding.
            c = pl.program_id(0)
            row = lax.broadcasted_iota(jnp.int32, (tile_rows, LANE), 0)
            global_row = (c * n_inner + i) * tile_rows + row
            val = jnp.where(global_row < rows, val, 0.0)

        # Fold this tile's sublane groups into an (8, 128) partial and
        # accumulate straight into the resident output block (no big scratch).
        o_ref[...] += jnp.sum(
            val.reshape(tile_rows // SUBLANE, SUBLANE, LANE), axis=0)

    return kernel


@functools.partial(jax.jit, static_argnames=("eps",))
def charbonnier_loss(x, y, eps=1e-06):
    """Pallas TPU Charbonnier loss: sum(sqrt((x - y)^2 + eps)) as float32."""
    assert x.shape == y.shape, "x and y must have the same shape"
    total = int(x.size)
    eps = float(eps)

    xf = x.reshape(-1)
    yf = y.reshape(-1)

    rows = total // LANE
    tail = total - rows * LANE

    tail_loss = jnp.float32(0.0)
    if tail:
        # <128-element ragged tail: tiny, handled with plain jnp.
        # TODO(synk): the prefix slice below still materializes a copy of the
        # lane-aligned part for non-128-multiple sizes; a manual-DMA 1-D path
        # would make this fully zero-copy.
        xt = lax.slice(xf, (rows * LANE,), (total,)).astype(jnp.float32)
        yt = lax.slice(yf, (rows * LANE,), (total,)).astype(jnp.float32)
        dt = xt - yt
        tail_loss = jnp.sum(jnp.sqrt(dt * dt + eps))
        if rows:
            xf = lax.slice(xf, (0,), (rows * LANE,))
            yf = lax.slice(yf, (0,), (rows * LANE,))

    gran = max(_sublane_multiple(x.dtype), _sublane_multiple(y.dtype))

    if rows < gran:
        # Too small to bother the kernel with (would need a block larger than
        # the array): finish with plain jnp.
        if rows:
            xm = lax.slice(xf, (0,), (rows * LANE,)).astype(jnp.float32)
            ym = lax.slice(yf, (0,), (rows * LANE,)).astype(jnp.float32)
            dm = xm - ym
            tail_loss = tail_loss + jnp.sum(jnp.sqrt(dm * dm + eps))
        return tail_loss

    num_cores = _num_tensorcores()
    if rows < num_cores * gran:
        num_cores = 1

    rows_per_core = _cdiv(rows, num_cores)
    tile_rows = min(TARGET_TILE_ROWS, _round_up(rows_per_core, gran))
    n_inner = _cdiv(rows_per_core, tile_rows)
    covered_rows = num_cores * n_inner * tile_rows
    need_mask = covered_rows != rows  # static Python decision

    x2d = xf.reshape(rows, LANE)  # zero-copy for lane-aligned inputs
    y2d = yf.reshape(rows, LANE)

    in_index_map = lambda c, i: (c * n_inner + i, 0)

    itemsize = jnp.dtype(x.dtype).itemsize
    cost = pl.CostEstimate(
        flops=4 * total,
        transcendentals=total,
        bytes_accessed=2 * total * itemsize + num_cores * SUBLANE * LANE * 4,
    )

    out = pl.pallas_call(
        _make_kernel(eps, rows, tile_rows, n_inner, need_mask),
        out_shape=jax.ShapeDtypeStruct((num_cores * SUBLANE, LANE), jnp.float32),
        grid_spec=pltpu.PrefetchScalarGridSpec(
            num_scalar_prefetch=0,
            grid=(num_cores, n_inner),
            in_specs=[
                pl.BlockSpec((tile_rows, LANE), in_index_map),
                pl.BlockSpec((tile_rows, LANE), in_index_map),
            ],
            out_specs=pl.BlockSpec((SUBLANE, LANE), lambda c, i: (c, 0)),
        ),
        compiler_params=pltpu.CompilerParams(
            dimension_semantics=("parallel", "arbitrary"),
            vmem_limit_bytes=32 << 20,
        ),
        cost_estimate=cost,
    )(x2d, y2d)

    # Tiny (<=16x128) final reduction + tail.
    return jnp.sum(out) + tail_loss


def charbonnier_loss_ref(x, y, eps=1e-06):
    diff = x.astype(jnp.float32) - y.astype(jnp.float32)
    return jnp.sum(jnp.sqrt(diff * diff + eps))


if __name__ == "__main__":
    key = jax.random.PRNGKey(0)
    kx, ky = jax.random.split(key)
    # NCHW inputs, like the PyTorch module would receive.
    x = jax.random.normal(kx, (2, 4, 16, 16), dtype=jnp.float32)
    y = jax.random.normal(ky, (2, 4, 16, 16), dtype=jnp.float32)

    loss = charbonnier_loss(x, y, eps=1e-06)
    jax.block_until_ready(loss)

    ref = charbonnier_loss_ref(x, y, eps=1e-06)
    assert jnp.allclose(loss, ref, rtol=1e-5, atol=1e-4), (loss, ref)

    print("KERNEL_OK")
</pallas_src>

<mosaic_0001>
module attributes {stable_mosaic.version = 11 : i64} {
  func.func @kernel(%arg0: i32, %arg1: i32, %arg2: memref<16x128xf32, #tpu.memory_space<vmem>>, %arg3: memref<16x128xf32, #tpu.memory_space<vmem>>, %arg4: memref<8x128xf32, #tpu.memory_space<vmem>>) attributes {dimension_semantics = [#tpu.dimension_semantics<parallel>, #tpu.dimension_semantics<arbitrary>], iteration_bounds = array<i64: 1, 1>, scalar_prefetch = 0 : i64, scratch_operands = 0 : i64, tpu.core_type = #tpu.core_type<tc>, window_params = [{transform_indices = @transform_0, window_bounds = array<i64: 16, 128>}, {transform_indices = @transform_1, window_bounds = array<i64: 16, 128>}, {transform_indices = @transform_2, window_bounds = array<i64: 8, 128>}]} {
    %c0_i32 = arith.constant 0 : i32
    %0 = arith.cmpi eq, %arg1, %c0_i32 : i32
    %1 = arith.extui %0 : i1 to i32
    %c0_i32_0 = arith.constant 0 : i32
    %2 = arith.cmpi ne, %1, %c0_i32_0 : i32
    scf.if %2 {
      %cst_9 = arith.constant 0.000000e+00 : f32
      %15 = vector.broadcast %cst_9 : f32 to vector<8x128xf32>
      %c0_10 = arith.constant 0 : index
      %c0_11 = arith.constant 0 : index
      %16 = vector.load %arg4[%c0_10, %c0_11] : memref<8x128xf32, #tpu.memory_space<vmem>>, vector<8x128xf32>
      tpu.vector_store %arg4[%c0_10, %c0_11], %15 {strides = array<i32>} : memref<8x128xf32, #tpu.memory_space<vmem>>, vector<8x128xf32>,
    } else {
    }
    %c0 = arith.constant 0 : index
    %c0_1 = arith.constant 0 : index
    %3 = vector.load %arg2[%c0, %c0_1] : memref<16x128xf32, #tpu.memory_space<vmem>>, vector<16x128xf32>
    %c0_2 = arith.constant 0 : index
    %c0_3 = arith.constant 0 : index
    %4 = vector.load %arg3[%c0_2, %c0_3] : memref<16x128xf32, #tpu.memory_space<vmem>>, vector<16x128xf32>
    %5 = arith.subf %3, %4 : vector<16x128xf32>
    %6 = arith.mulf %5, %5 : vector<16x128xf32>
    %cst = arith.constant 9.99999997E-7 : f32
    %7 = vector.broadcast %cst : f32 to vector<16x128xf32>
    %8 = arith.addf %6, %7 : vector<16x128xf32>
    %9 = math.sqrt %8 : vector<16x128xf32>
    %c0_4 = arith.constant 0 : index
    %c0_5 = arith.constant 0 : index
    %10 = vector.load %arg4[%c0_4, %c0_5] : memref<8x128xf32, #tpu.memory_space<vmem>>, vector<8x128xf32>
    %11 = vector.shape_cast %9 : vector<16x128xf32> to vector<2x8x128xf32>
    %cst_6 = arith.constant dense<0.000000e+00> : vector<8x128xf32>
    %12 = vector.multi_reduction <add>, %11, %cst_6 [0] : vector<2x8x128xf32> to vector<8x128xf32>
    %13 = arith.addf %10, %12 : vector<8x128xf32>
    %c0_7 = arith.constant 0 : index
    %c0_8 = arith.constant 0 : index
    %14 = vector.load %arg4[%c0_7, %c0_8] : memref<8x128xf32, #tpu.memory_space<vmem>>, vector<8x128xf32>
    tpu.vector_store %arg4[%c0_7, %c0_8], %13 {strides = array<i32>} : memref<8x128xf32, #tpu.memory_space<vmem>>, vector<8x128xf32>,
    return
  }
  func.func @transform_0(%arg0: i32, %arg1: i32) -> (i32, i32) {
    %c1_i32 = arith.constant 1 : i32
    %0 = arith.muli %arg0, %c1_i32 : i32
    %1 = arith.addi %0, %arg1 : i32
    %c0_i32 = arith.constant 0 : i32
    %c0_i32_0 = arith.constant 0 : i32
    return %1, %c0_i32 : i32, i32
  }
  func.func @transform_1(%arg0: i32, %arg1: i32) -> (i32, i32) {
    %c1_i32 = arith.constant 1 : i32
    %0 = arith.muli %arg0, %c1_i32 : i32
    %1 = arith.addi %0, %arg1 : i32
    %c0_i32 = arith.constant 0 : i32
    %c0_i32_0 = arith.constant 0 : i32
    return %1, %c0_i32 : i32, i32
  }
  func.func @transform_2(%arg0: i32, %arg1: i32) -> (i32, i32) {
    %c0_i32 = arith.constant 0 : i32
    %c0_i32_0 = arith.constant 0 : i32
    return %arg0, %c0_i32 : i32, i32
  }
}

</mosaic_0001>

<bundles_post_ra>
// kernel: charbonnier_loss.1
= control target key start
LH: loop header
LB: loop body
LE: loop exit
PB: predicated region body
PF: predicated region fallthrough
CT: control target
= control target key end

     0   :  { %s139_s0 = inlined_call_operand.vmem [shape: f32[16,128], index: 0, kind: input, shape index: {}]   ;;  %s140_s1 = inlined_call_operand.vmem [shape: f32[16,128], index: 1, kind: input, shape index: {}]   ;;  %s141_s2 = inlined_call_operand.vmem [shape: f32[8,128], index: 2, kind: output, shape index: {}]  }
   0x1   :  { %v60_v0 = vld [vmem:[%s139_s0] sm:$0xff]  ;;  %v61_v1 = vld [vmem:[%s139_s0 + $0x8] sm:$0xff] }
   0x2   :  { %v62_v2 = vld [vmem:[%s140_s1] sm:$0xff]  ;;  %v63_v3 = vld [vmem:[%s140_s1 + $0x8] sm:$0xff] }
   0x3   :  { %v64_v4 = vsub.f32 %v60_v0, %v62_v2  ;;  %v65_v5 = vsub.f32 %v61_v1, %v63_v3 }
   0x5   :  { %v66_v6 = vmul.f32 %v64_v4, %v64_v4  ;;  %v67_v7 = vmul.f32 %v65_v5, %v65_v5 }
   0x7   :  { %v68_v8 = vadd.f32 1e-06, %v66_v6  ;;  %v69_v9 = vadd.f32 1e-06, %v67_v7 }
   0x9   :  { %105 = vrsqrt.f32 %v68_v8  ;;  %vm72_vm0 = vcmp.eq.f32.partialorder %v68_v8, inf  ;;  %v75_v11 = vand.u32 2147483648, %v68_v8  ;;  %vm74_vm1 = vcmp.eq.f32.partialorder %v68_v8, 0.0 }
   0xa   :  { %107 = vrsqrt.f32 %v69_v9  ;;  %vm79_vm2 = vcmp.eq.f32.partialorder %v69_v9, inf  ;;  %v82_v14 = vand.u32 2147483648, %v69_v9  ;;  %vm81_vm3 = vcmp.eq.f32.partialorder %v69_v9, 0.0 }
  0x13   :  { %v106_v10 = vpop.eup %105 }
  0x14   :  { %v108_v12 = vpop.eup %107  ;;  %v71_v13 = vmul.f32 %v106_v10, %v68_v8 }
  0x15   :  { %v78_v15 = vmul.f32 %v108_v12, %v69_v9 }
  0x16   :  { %v73_v16 = vsel %vm72_vm0, %v68_v8, %v71_v13 }
  0x17   :  { %v76_v17 = vsel %vm74_vm1, %v75_v11, %v73_v16  ;;  %v80_v18 = vsel %vm79_vm2, %v69_v9, %v78_v15 }
  0x18   :  { %v83_v19 = vsel %vm81_vm3, %v82_v14, %v80_v18 }
  0x19   :  { %v85_v20 = vadd.f32 %v83_v19, %v76_v17 }
  0x1b   :  { %87 = vst [vmem:[%s141_s2] sm:$0xff] %v85_v20 }

</bundles_post_ra>
